<compile_context>
chip_gen: v5e
topology: v5e:2x2
jax: 0.10.0
libtpu: 0.0.40
codegen_flags: <defaults>
</compile_context>

<pallas_src>
import jax
import jax.numpy as jnp
from jax.experimental import pallas as pl
from jax.experimental.pallas import tpu as pltpu


def _make_reg_kernel(C, TILE, HW, need_mask, n_chunks, chunks_per_core):
    inv_c = 1.0 / float(C)

    def kernel(rgb_ref, ir_ref, al_ref, q_ref, acc_ref):
        c = pl.program_id(0)   # core-split index
        j = pl.program_id(2)   # pixel-chunk index within this core (reduction)

        # Packed accumulator block is resident across the pixel axis.
        @pl.when(j == 0)
        def _init():
            acc_ref[...] = jnp.zeros_like(acc_ref)

        rgb = rgb_ref[0].astype(jnp.float32)   # (C, TILE)
        ir = ir_ref[0].astype(jnp.float32)     # (C, TILE)
        al = al_ref[0].astype(jnp.float32)     # (C, TILE)
        q = q_ref[0].astype(jnp.float32)       # (1, TILE)

        dp = rgb - al
        dn = rgb - ir
        cs_pos = jnp.sum(dp * dp, axis=0, keepdims=True)   # (1, TILE)
        cs_neg = jnp.sum(dn * dn, axis=0, keepdims=True)   # (1, TILE)
        qe = q - jnp.exp(-cs_pos * inv_c)
        qerr = qe * qe                                      # (1, TILE)

        pad = jnp.zeros((5, TILE), jnp.float32)

        def accumulate(p, n, e):
            # One sublane-aligned (8, TILE) slab: rows 0..2 = pos/neg/qerr.
            upd = jnp.concatenate([p, n, e, pad], axis=0)
            acc_ref[0, 0] = acc_ref[0, 0] + upd

        if need_mask:
            g = c * chunks_per_core + j            # global pixel-chunk index
            is_last = g == (n_chunks - 1)

            @pl.when(jnp.logical_not(is_last))
            def _full():
                accumulate(cs_pos, cs_neg, qerr)

            @pl.when(is_last)
            def _edge():
                col = g * TILE + jax.lax.broadcasted_iota(jnp.int32, (1, TILE), 1)
                valid = col < HW
                z = jnp.zeros_like(cs_pos)
                # Keep these as true selects (NOT multiply-by-mask): padded
                # lanes may hold NaN/Inf that must not reach the accumulator.
                accumulate(jnp.where(valid, cs_pos, z),
                           jnp.where(valid, cs_neg, z),
                           jnp.where(valid, qerr, z))
        else:
            accumulate(cs_pos, cs_neg, qerr)

    return kernel


def registration_loss(rgb_desc, ir_desc, aligned_desc, transform_matrix,
                      quality_map, weights=None):
    """Matches RegistrationLoss.forward: returns (total_loss, losses_dict)."""
    if weights is None:
        weights = {'desc': 1.0, 'smooth': 0.5, 'quality': 0.3}

    B, C, H, W = rgb_desc.shape
    HW = H * W
    itemsize = jnp.dtype(rgb_desc.dtype).itemsize

    # ---- generation-aware VMEM budget -------------------------------------
    try:
        vmem_cap = int(pltpu.get_tpu_info().vmem_capacity_bytes)
    except Exception:  # conservative default if the query is unavailable
        vmem_cap = 64 << 20
    big_vmem = vmem_cap >= (100 << 20)          # v5e/v6e (128 MiB) vs v7x (64 MiB)
    budget = (28 << 20) if big_vmem else (14 << 20)

    def in_block_bytes(t):
        # native-dtype input block for one grid step (3 descriptors + quality)
        return (3 * C + 1) * t * itemsize

    def footprint(t):
        # double-buffered inputs + in-kernel f32 intermediates + packed acc
        f32_tmp = (5 * C + 8) * t * 4
        acc_bytes = 2 * 8 * t * 4
        return 2 * in_block_bytes(t) + f32_tmp + acc_bytes

    # ---- pick a lane tile: as big as the (intermediate-aware) budget allows
    CANDS = (32768, 16384, 8192, 4096, 2048, 1024, 512, 256, 128)
    usable = [t for t in CANDS if t <= HW]
    if not usable:
        TILE = max(HW, 1)                       # tiny spatial extent
    else:
        fitting = [t for t in usable if footprint(t) <= budget]
        if fitting:
            best = fitting[0]
            # Prefer an HW-dividing tile (no ragged edge) if one exists within
            # 2x of the largest fitting candidate.
            divisible = [t for t in fitting if HW % t == 0 and t * 2 >= best]
            TILE = divisible[0] if divisible else best
        else:
            TILE = usable[-1]                   # 128: smallest legal tile

    need_mask = (HW % TILE) != 0
    n_chunks = pl.cdiv(HW, TILE)

    # ---- optional 2-way core split of the reduction axis (v7x megacore when
    #      the batch axis alone can't keep both TensorCores busy).
    n_split = 1
    if (B % 2 == 1) and (n_chunks >= 2) and (n_chunks % 2 == 0):
        n_split = 2
    chunks_per_core = n_chunks // n_split

    # ---- free reshapes only (no transpose, no dtype cast) ------------------
    rgb = rgb_desc.reshape(B, C, HW)
    ir = ir_desc.reshape(B, C, HW)
    al = aligned_desc.reshape(B, C, HW)
    q = quality_map.reshape(B, 1, HW)

    kernel = _make_reg_kernel(C, TILE, HW, need_mask, n_chunks, chunks_per_core)

    def desc_map(c, b, j):
        return (b, 0, c * chunks_per_core + j)

    def qmap_map(c, b, j):
        return (b, 0, c * chunks_per_core + j)

    def acc_map(c, b, j):
        return (c, b, 0, 0)

    # Deeper pipelining only pays when the per-step block stays small.
    deep_pipeline = (in_block_bytes(TILE) < (1 << 20)) and (chunks_per_core >= 3)
    pipe_kw = dict(pipeline_mode=pl.Buffered(3)) if deep_pipeline else {}

    desc_spec = pl.BlockSpec((1, C, TILE), desc_map, **pipe_kw)
    qmap_spec = pl.BlockSpec((1, 1, TILE), qmap_map, **pipe_kw)
    acc_spec = pl.BlockSpec((1, 1, 8, TILE), acc_map)
    acc_shape = jax.ShapeDtypeStruct((n_split, B, 8, TILE), jnp.float32)

    vmem_cap_limit = (100 << 20) if big_vmem else (56 << 20)
    vmem_limit = int(min(max(footprint(TILE) + (8 << 20), 32 << 20), vmem_cap_limit))

    cost = pl.CostEstimate(
        flops=int(B * HW * (6 * C + 6)),
        transcendentals=int(B * HW),
        bytes_accessed=int((3 * C + 1) * B * HW * itemsize
                           + n_split * B * 8 * TILE * 4),
    )

    acc = pl.pallas_call(
        kernel,
        out_shape=acc_shape,
        grid=(n_split, B, chunks_per_core),
        in_specs=[desc_spec, desc_spec, desc_spec, qmap_spec],
        out_specs=acc_spec,
        compiler_params=pltpu.CompilerParams(
            dimension_semantics=("parallel", "parallel", "arbitrary"),
            vmem_limit_bytes=vmem_limit,
        ),
        cost_estimate=cost,
    )(rgb, ir, al, q)

    # ---- tiny final reductions / scalar glue (plain JAX) -------------------
    n_desc = float(B * C * HW)
    n_q = float(B * HW)

    pos_mse = jnp.sum(acc[:, :, 0, :]) / n_desc
    neg_mse = jnp.sum(acc[:, :, 1, :]) / n_desc
    desc_loss = pos_mse + jnp.maximum(jnp.float32(0.0), 0.5 - neg_mse)
    quality_loss = jnp.sum(acc[:, :, 2, :]) / n_q

    # Smoothness term: (B, 3, 3) elements -- not worth a kernel / DMA.
    ident = jnp.eye(3, dtype=jnp.float32)
    smooth_loss = jnp.mean((transform_matrix.astype(jnp.float32) - ident[None]) ** 2)

    losses = {
        'desc_loss': weights['desc'] * desc_loss,
        'smooth_loss': weights['smooth'] * smooth_loss,
        'quality_loss': weights['quality'] * quality_loss,
    }
    total = losses['desc_loss'] + losses['smooth_loss'] + losses['quality_loss']
    return total, losses


def _reference(rgb, ir, al, t, q, weights):
    rgb = rgb.astype(jnp.float32)
    ir = ir.astype(jnp.float32)
    al = al.astype(jnp.float32)
    q = q.astype(jnp.float32)
    t = t.astype(jnp.float32)
    pos = jnp.mean((rgb - al) ** 2)
    neg = jnp.maximum(0.0, 0.5 - jnp.mean((rgb - ir) ** 2))
    desc = pos + neg
    ident = jnp.broadcast_to(jnp.eye(3, dtype=jnp.float32), t.shape)
    smooth = jnp.mean((t - ident) ** 2)
    diff = jnp.mean((al - rgb) ** 2, axis=1, keepdims=True)
    quality = jnp.mean((q - jnp.exp(-diff)) ** 2)
    return (weights['desc'] * desc + weights['smooth'] * smooth
            + weights['quality'] * quality)


if __name__ == "__main__":
    weights = {'desc': 1.0, 'smooth': 0.5, 'quality': 0.3}

    def run_case(key, B, C, H, W):
        k1, k2, k3, k4, k5 = jax.random.split(key, 5)
        rgb_desc = jax.random.normal(k1, (B, C, H, W), jnp.float32)
        ir_desc = jax.random.normal(k2, (B, C, H, W), jnp.float32)
        aligned_desc = rgb_desc + 0.1 * jax.random.normal(k3, (B, C, H, W), jnp.float32)
        transform_matrix = (jnp.eye(3, dtype=jnp.float32)[None]
                            + 0.05 * jax.random.normal(k4, (B, 3, 3), jnp.float32))
        quality_map = jax.nn.sigmoid(jax.random.normal(k5, (B, 1, H, W), jnp.float32))

        total, _losses = registration_loss(rgb_desc, ir_desc, aligned_desc,
                                           transform_matrix, quality_map, weights)
        total = jax.block_until_ready(total)
        ref_total = _reference(rgb_desc, ir_desc, aligned_desc,
                               transform_matrix, quality_map, weights)
        assert jnp.allclose(total, ref_total, rtol=1e-5, atol=1e-6), (total, ref_total)

    key = jax.random.PRNGKey(0)
    k_main, k_edge = jax.random.split(key, 2)

    # Main case (divisible pixel count, even batch -> no mask, no core split).
    run_case(k_main, B=2, C=4, H=16, W=16)
    # Edge case: odd batch + HW not a multiple of the tile -> exercises the
    # ragged-edge masked path and the 2-way core-split accumulators on HW.
    run_case(k_edge, B=1, C=4, H=10, W=13)

    print("KERNEL_OK")
</pallas_src>

<mosaic_0001>
module attributes {stable_mosaic.version = 11 : i64} {
  func.func @kernel(%arg0: i32, %arg1: i32, %arg2: i32, %arg3: memref<1x4x256xf32, #tpu.memory_space<vmem>>, %arg4: memref<1x4x256xf32, #tpu.memory_space<vmem>>, %arg5: memref<1x4x256xf32, #tpu.memory_space<vmem>>, %arg6: memref<1x1x256xf32, #tpu.memory_space<vmem>>, %arg7: memref<1x1x8x256xf32, #tpu.memory_space<vmem>>) attributes {dimension_semantics = [#tpu.dimension_semantics<parallel>, #tpu.dimension_semantics<parallel>, #tpu.dimension_semantics<arbitrary>], iteration_bounds = array<i64: 1, 2, 1>, scalar_prefetch = 0 : i64, scratch_operands = 0 : i64, tpu.core_type = #tpu.core_type<tc>, window_params = [{transform_indices = @transform_0, window_bounds = array<i64: 1, 4, 256>}, {transform_indices = @transform_1, window_bounds = array<i64: 1, 4, 256>}, {transform_indices = @transform_2, window_bounds = array<i64: 1, 4, 256>}, {transform_indices = @transform_3, window_bounds = array<i64: 1, 1, 256>}, {transform_indices = @transform_4, window_bounds = array<i64: 1, 1, 8, 256>}]} {
    %c0_i32 = arith.constant 0 : i32
    %0 = arith.cmpi eq, %arg2, %c0_i32 : i32
    %1 = arith.extui %0 : i1 to i32
    %c0_i32_0 = arith.constant 0 : i32
    %2 = arith.cmpi ne, %1, %c0_i32_0 : i32
    scf.if %2 {
      %cst_24 = arith.constant 0.000000e+00 : f32
      %34 = vector.broadcast %cst_24 : f32 to vector<1x1x8x256xf32>
      %c0_25 = arith.constant 0 : index
      %c0_26 = arith.constant 0 : index
      %c0_27 = arith.constant 0 : index
      %c0_28 = arith.constant 0 : index
      %35 = vector.load %arg7[%c0_25, %c0_26, %c0_27, %c0_28] : memref<1x1x8x256xf32, #tpu.memory_space<vmem>>, vector<1x1x8x256xf32>
      tpu.vector_store %arg7[%c0_25, %c0_26, %c0_27, %c0_28], %34 {strides = array<i32>} : memref<1x1x8x256xf32, #tpu.memory_space<vmem>>, vector<1x1x8x256xf32>,
    } else {
    }
    %c0 = arith.constant 0 : index
    %c0_1 = arith.constant 0 : index
    %c0_2 = arith.constant 0 : index
    %3 = vector.load %arg3[%c0, %c0_1, %c0_2] : memref<1x4x256xf32, #tpu.memory_space<vmem>>, vector<1x4x256xf32>
    %4 = vector.shape_cast %3 : vector<1x4x256xf32> to vector<4x256xf32>
    %c0_3 = arith.constant 0 : index
    %c0_4 = arith.constant 0 : index
    %c0_5 = arith.constant 0 : index
    %5 = vector.load %arg4[%c0_3, %c0_4, %c0_5] : memref<1x4x256xf32, #tpu.memory_space<vmem>>, vector<1x4x256xf32>
    %6 = vector.shape_cast %5 : vector<1x4x256xf32> to vector<4x256xf32>
    %c0_6 = arith.constant 0 : index
    %c0_7 = arith.constant 0 : index
    %c0_8 = arith.constant 0 : index
    %7 = vector.load %arg5[%c0_6, %c0_7, %c0_8] : memref<1x4x256xf32, #tpu.memory_space<vmem>>, vector<1x4x256xf32>
    %8 = vector.shape_cast %7 : vector<1x4x256xf32> to vector<4x256xf32>
    %c0_9 = arith.constant 0 : index
    %c0_10 = arith.constant 0 : index
    %c0_11 = arith.constant 0 : index
    %9 = vector.load %arg6[%c0_9, %c0_10, %c0_11] : memref<1x1x256xf32, #tpu.memory_space<vmem>>, vector<1x1x256xf32>
    %10 = vector.shape_cast %9 : vector<1x1x256xf32> to vector<1x256xf32>
    %11 = arith.subf %4, %8 : vector<4x256xf32>
    %12 = arith.subf %4, %6 : vector<4x256xf32>
    %13 = arith.mulf %11, %11 : vector<4x256xf32>
    %cst = arith.constant dense<0.000000e+00> : vector<256xf32>
    %14 = vector.multi_reduction <add>, %13, %cst [0] : vector<4x256xf32> to vector<256xf32>
    %15 = vector.shape_cast %14 : vector<256xf32> to vector<1x256xf32>
    %16 = arith.mulf %12, %12 : vector<4x256xf32>
    %cst_12 = arith.constant dense<0.000000e+00> : vector<256xf32>
    %17 = vector.multi_reduction <add>, %16, %cst_12 [0] : vector<4x256xf32> to vector<256xf32>
    %18 = vector.shape_cast %17 : vector<256xf32> to vector<1x256xf32>
    %cst_13 = arith.constant 0.000000e+00 : f32
    %19 = vector.broadcast %cst_13 : f32 to vector<1x256xf32>
    %20 = arith.subf %19, %15 : vector<1x256xf32>
    %cst_14 = arith.constant 2.500000e-01 : f32
    %21 = vector.broadcast %cst_14 : f32 to vector<1x256xf32>
    %22 = arith.mulf %20, %21 : vector<1x256xf32>
    %23 = math.exp %22 : vector<1x256xf32>
    %24 = arith.subf %10, %23 : vector<1x256xf32>
    %25 = arith.mulf %24, %24 : vector<1x256xf32>
    %cst_15 = arith.constant 0.000000e+00 : f32
    %26 = vector.broadcast %cst_15 : f32 to vector<5x256xf32>
    %27 = tpu.concatenate %15, %18, %25, %26 in 0 : vector<1x256xf32>, vector<1x256xf32>, vector<1x256xf32>, vector<5x256xf32> -> vector<8x256xf32>
    %c0_16 = arith.constant 0 : index
    %c0_17 = arith.constant 0 : index
    %c0_18 = arith.constant 0 : index
    %c0_19 = arith.constant 0 : index
    %28 = vector.load %arg7[%c0_16, %c0_17, %c0_18, %c0_19] : memref<1x1x8x256xf32, #tpu.memory_space<vmem>>, vector<1x1x8x256xf32>
    %29 = vector.shape_cast %28 : vector<1x1x8x256xf32> to vector<8x256xf32>
    %30 = arith.addf %29, %27 : vector<8x256xf32>
    %c0_20 = arith.constant 0 : index
    %c0_21 = arith.constant 0 : index
    %c0_22 = arith.constant 0 : index
    %c0_23 = arith.constant 0 : index
    %31 = vector.load %arg7[%c0_20, %c0_21, %c0_22, %c0_23] : memref<1x1x8x256xf32, #tpu.memory_space<vmem>>, vector<1x1x8x256xf32>
    %32 = vector.shape_cast %31 : vector<1x1x8x256xf32> to vector<8x256xf32>
    %33 = vector.shape_cast %30 : vector<8x256xf32> to vector<1x1x8x256xf32>
    tpu.vector_store %arg7[%c0_20, %c0_21, %c0_22, %c0_23], %33 {strides = array<i32>} : memref<1x1x8x256xf32, #tpu.memory_space<vmem>>, vector<1x1x8x256xf32>,
    return
  }
  func.func @transform_0(%arg0: i32, %arg1: i32, %arg2: i32) -> (i32, i32, i32) {
    %c1_i32 = arith.constant 1 : i32
    %0 = arith.muli %arg0, %c1_i32 : i32
    %1 = arith.addi %0, %arg2 : i32
    %c0_i32 = arith.constant 0 : i32
    %c0_i32_0 = arith.constant 0 : i32
    return %arg1, %c0_i32, %1 : i32, i32, i32
  }
  func.func @transform_1(%arg0: i32, %arg1: i32, %arg2: i32) -> (i32, i32, i32) {
    %c1_i32 = arith.constant 1 : i32
    %0 = arith.muli %arg0, %c1_i32 : i32
    %1 = arith.addi %0, %arg2 : i32
    %c0_i32 = arith.constant 0 : i32
    %c0_i32_0 = arith.constant 0 : i32
    return %arg1, %c0_i32, %1 : i32, i32, i32
  }
  func.func @transform_2(%arg0: i32, %arg1: i32, %arg2: i32) -> (i32, i32, i32) {
    %c1_i32 = arith.constant 1 : i32
    %0 = arith.muli %arg0, %c1_i32 : i32
    %1 = arith.addi %0, %arg2 : i32
    %c0_i32 = arith.constant 0 : i32
    %c0_i32_0 = arith.constant 0 : i32
    return %arg1, %c0_i32, %1 : i32, i32, i32
  }
  func.func @transform_3(%arg0: i32, %arg1: i32, %arg2: i32) -> (i32, i32, i32) {
    %c1_i32 = arith.constant 1 : i32
    %0 = arith.muli %arg0, %c1_i32 : i32
    %1 = arith.addi %0, %arg2 : i32
    %c0_i32 = arith.constant 0 : i32
    %c0_i32_0 = arith.constant 0 : i32
    return %arg1, %c0_i32, %1 : i32, i32, i32
  }
  func.func @transform_4(%arg0: i32, %arg1: i32, %arg2: i32) -> (i32, i32, i32, i32) {
    %c0_i32 = arith.constant 0 : i32
    %c0_i32_0 = arith.constant 0 : i32
    %c0_i32_1 = arith.constant 0 : i32
    return %arg0, %arg1, %c0_i32, %c0_i32_0 : i32, i32, i32, i32
  }
}

</mosaic_0001>

<bundles_post_ra>
// kernel: tpu_custom_call.1
= control target key start
LH: loop header
LB: loop body
LE: loop exit
PB: predicated region body
PF: predicated region fallthrough
CT: control target
= control target key end

     0   :  { %s1190_s0 = inlined_call_operand.hbm [shape: f32[2,4,256], index: 0, kind: input, shape index: {}]   ;;  %s1191_s1 = inlined_call_operand.hbm [shape: f32[2,4,256], index: 1, kind: input, shape index: {}]   ;;  %s1192_s2 = inlined_call_operand.hbm [shape: f32[2,4,256], index: 2, kind: input, shape index: {}]   ;;  %s1193_s3 = inlined_call_operand.hbm [shape: f32[2,1,256], index: 3, kind: input, shape index: {}]   ;;  %s1194_s4 = inlined_call_operand.hbm [shape: f32[1,2,8,256], index: 4, kind: output, shape index: {}]  }
   0x1   :  { %1199 = sst [smem:[#allocation19_spill]] %s1190_s0 }
   0x2   :  { %1200 = sst [smem:[#allocation20_spill]] %s1191_s1 }
   0x3   :  { %9 = vsyncpa [#allocation3], 0 }
   0x4   :  { %11 = vsyncpa [#allocation3 + $0x1], 0 }
   0x5   :  { %12 = vsyncpa [#allocation6], 0 }
   0x6   :  { %14 = vsyncpa [#allocation6 + $0x1], 0 }
   0x7   :  { %15 = vsyncpa [#allocation9], 0 }
   0x8   :  { %17 = vsyncpa [#allocation9 + $0x1], 0 }
   0x9   :  { %18 = vsyncpa [#allocation4], 0 }
   0xa   :  { %20 = vsyncpa [#allocation4 + $0x1], 0  ;;  %s1012_s15 = smov 0   ;;  %s1014_s16 = smov 0  }
   0xb   :  { %s1016_s17 = smov 0   ;;  %s1018_s18 = smov 0  }
   0xc   :  { %s1020_s19 = smov 0   ;;  %s1022_s20 = smov 0  }
   0xd LB: > { %1201 = sst [smem:[#allocation15_spill]] %s973_s17  ;;  %s1043_s21 = sadd.s32 4294967295, %s985_s20   ;;  %s985_s20 = sphi %s1022_s20, %s26_s20   ;;  %s981_s19 = sphi %s1020_s19, %s1220_s19   ;;  %s977_s18 = sphi %s1018_s18, %s1219_s18   ;;  %s973_s17 = sphi %s1016_s17, %s1215_s17   ;;  %s969_s16 = sphi %s1014_s16, %s1218_s16   ;;  %s965_s15 = sphi %s1012_s15, %s1217_s15  }
   0xe   : > { %1202 = sst [smem:[#allocation16_spill]] %s985_s20  ;;  %s664_s22 = sadd.s32 4294967294, %s985_s20  }
   0xf   : > { %s41_s23 = sadd.s32 1, %s981_s19  ;;  %s56_s24 = sadd.s32 1, %s973_s17 }
  0x10   : > { %p43_p0 = scmp.ge.s32.totalorder %s41_s23, 2  ;;  %p63_p1 = scmp.ne.s32.totalorder %s973_s17, %s969_s16 }
  0x11   : > { %p64_p2 = scmp.eq.s32.totalorder %s985_s20, 0  ;;  %p69_p3 = scmp.ne.s32.totalorder %s969_s16, %s965_s15 }
  0x12   : > { %s1222_s23 = smov (%p43_p0, %s41_s23), 0  ;;  %p70_p5 = scmp.eq.s32.totalorder %s1043_s21, 0 }
  0x13   : > { %1203 = sst [smem:[#allocation17_spill]] %s1222_s23  ;;  %p1055_p4 = por %p64_p2, %p63_p1 }
  0x14   : > { %s51_s26 = ssub.s32 %s981_s19, %s1222_s23  ;;  %p185_p6 = scmp.eq.s32.totalorder %s1043_s21, 1 }
  0x15   : > { %p54_p7 = scmp.eq.s32.totalorder %s51_s26, 0  ;;  %p1063_p8 = por %p70_p5, %p69_p3 }
  0x16   : > { %p1067_p9 = por %p185_p6, %p63_p1  ;;  %p191_p10 = scmp.eq.s32.totalorder %s664_s22, 1 }
  0x17   : > { %s1072_s29 = scalar_select %p54_p7, %s973_s17, %s56_s24  }
  0x18   : > { %p1074_p11 = por %p191_p10, %p69_p3  ;;  %p666_p12 = scmp.ge.s32.totalorder %s985_s20, 2 }
  0x19   : > { %1207 = sst [smem:[#allocation18_spill]] %s1072_s29  ;;  %p720_p13 = scmp.lt.s32.totalorder %s985_s20, 2 }
  0x1a   : > { %s1081_s5 = sand.u32 1, %s973_s17   ;;  %s689_s7 = sshll.u32 %s981_s19, 3 }
  0x1b   : > { %s667_s6 = sshll.u32 %s1081_s5, 3  ;;  %p1087_p0 = pnand %p720_p13, %p1055_p4 }
  0x1c   : > { %s234_s9 = sand.u32 1, %s985_s20   ;;  %s1210_s1 = sld [smem:[#allocation20_spill]] }
  0x1d   : > { %s238_s14 = scalar_lea.vmem [#allocation5], %s667_s6  ;;  %s235_s24 = scalar_lea.sflag [#allocation6], %s234_s9 }
  0x1e   : > { %s250_s22 = sshll.u32 %s238_s14, 4  ;;  %p678_p1 = scmp.ge.s32.totalorder %s985_s20, 1  ;;  %s251_s22 = int_to_ptr.vmem [resolvable:$true] %s250_s22 }
  0x1f   : > { %p300_p2 = scmp.lt.s32.totalorder %s985_s20, 3  ;;  %s1212_s0 = sld [smem:[#allocation19_spill]] }
  0x20   : > { %s215_s14 = scalar_lea.vmem [#allocation2], %s667_s6  ;;  %s212_s9 = scalar_lea.sflag [#allocation3], %s1081_s5 }
  0x21   : > { %p1099_p3 = pnand %p678_p1, %p300_p2  ;;  %s269_s23 = scalar_lea.hbm %s1192_s2, %s689_s7 }
  0x22   : > { %s246_s12 = scalar_lea.hbm %s1210_s1, %s689_s7  ;;  %s227_s1 = sshll.u32 %s215_s14, 4  ;;  %s228_s1 = int_to_ptr.vmem [resolvable:$true] %s227_s1 }
  0x23   : > { %s248_s13 = sshll.u32 %s246_s12, 4  ;;  %s271_s29 = sshll.u32 %s269_s23, 4  ;;  %s249_s13 = int_to_ptr.hbm [resolvable:$true] %s248_s13  ;;  %s272_s29 = int_to_ptr.hbm [resolvable:$true] %s271_s29 }
  0x24   : > { %709 = dma.hbm_to_vmem [thread:$0]  (!%p1087_p0), %s249_s13, 128, %s251_s22, %s235_s24  }
  0x25   : > { %s223_s11 = scalar_lea.hbm %s1212_s0, %s689_s7  ;;  %s261_s17 = scalar_lea.vmem [#allocation7], %s667_s6 }
  0x26   : > { %s225_s12 = sshll.u32 %s223_s11, 4  ;;  %s273_s26 = sshll.u32 %s261_s17, 4  ;;  %s226_s12 = int_to_ptr.hbm [resolvable:$true] %s225_s12  ;;  %s274_s26 = int_to_ptr.vmem [resolvable:$true] %s273_s26 }
  0x27   : > { %706 = dma.hbm_to_vmem [thread:$0]  (!%p1087_p0), %s226_s12, 128, %s228_s1, %s212_s9  }
  0x28   : > { %712 = dma.hbm_to_vmem [thread:$0]  (!%p1087_p0), %s272_s29, 128, %s274_s26, %s235_s24  }
  0x29   : > { %s676_s10 = sshll.u32 %s1081_s5, 1  ;;  %s677_s11 = sshll.u32 %s981_s19, 1 }
  0x2a   : > { %s291_s20 = scalar_lea.hbm %s1193_s3, %s677_s11  ;;  %s284_s1 = scalar_lea.vmem [#allocation8], %s676_s10 }
  0x2b   : > { %s295_s12 = sshll.u32 %s284_s1, 4  ;;  %s293_s9 = sshll.u32 %s291_s20, 4  ;;  %s296_s12 = int_to_ptr.vmem [resolvable:$true] %s295_s12  ;;  %s294_s9 = int_to_ptr.hbm [resolvable:$true] %s293_s9 }
  0x2c   : > { %s281_s7 = scalar_lea.sflag [#allocation9], %s1081_s5  ;;  %304 = sbr.rel (%p1099_p3) target bundleno = 111 (0x6f), region = 36 }
  0x2d   : > { %715 = dma.hbm_to_vmem [thread:$0]  (!%p1087_p0), %s294_s9, 32, %s296_s12, %s281_s7  }
  0x2e   : > { %s1125_s17 = sand.u32 (!%p1099_p3), 1, %s969_s16  }
  0x2f   : > { %s679_s23 = sshll.u32 (!%p1099_p3), %s1125_s17, 3  ;;  %s307_s0 = scalar_lea.sflag (!%p1099_p3), [#allocation3], %s1125_s17 }
  0x30   : > { %s310_s29 = scalar_lea.vmem (!%p1099_p3), [#allocation2], %s679_s23 }
  0x31   : > { %948 = dma.done.wait (%p1063_p8), %s307_s0, 128  }
  0x32   : > { %950 = vsyncadd (%p1063_p8), %s307_s0, 4294967168  ;;  %s316_s20 = sand.u32 1, %s1043_s21   ;;  %s320_s6 = scalar_lea.vmem [#allocation5], %s679_s23 }
  0x33   : > { %s317_s5 = scalar_lea.sflag [#allocation6], %s316_s20 }
  0x34   : > { %952 = dma.done.wait (%p1063_p8), %s317_s5, 256  }
  0x35   : > { %954 = vsyncadd (%p1063_p8), %s317_s5, 4294967040  ;;  %s682_s8 = sshll.u32 %s1125_s17, 1  ;;  %s330_s24 = scalar_lea.vmem [#allocation7], %s679_s23 }
  0x36   : > { %s337_s25 = scalar_lea.sflag [#allocation9], %s1125_s17  ;;  %s1140_s13 = scalar_lea.vmem [#allocation8], %s682_s8 }
  0x37   : > { %956 = dma.done.wait (%p1063_p8), %s337_s25, 32  }
  0x38   : > { %958 = vsyncadd (%p1063_p8), %s337_s25, 4294967264  ;;  %v395_v0 = vld [vmem:[%s310_s29] sm:$0xff]  ;;  %v396_v3 = vld [vmem:[%s320_s6] sm:$0xff]  ;;  %vm408_vm0 = vcmask 1043456   ;;  %vm455_vm1 = vcmask 1040384   ;;  %s683_s21 = sshll.u32 %s1125_s17, 4 }
  0x39   : > { %v397_v1 = vld [vmem:[%s330_s24] sm:$0xff]  ;;  %v400_v5 = vsub.f32 %v395_v0, %v396_v3  ;;  %v398_v43 = vld [vmem:[%s1140_s13] sm:$0x3]  ;;  %s692_s27 = sshll.u32 %s977_s18, 4  ;;  %vm467_vm2 = vcmask 1041408   ;;  %vm470_vm3 = vcmask 1042432  }
  0x3a   : > { %v399_v2 = vsub.f32 %v395_v0, %v397_v1  ;;  %s493_s10 = scalar_lea.hbm %s1194_s4, %s692_s27  ;;  %s380_s11 = scalar_lea.vmem [#allocation10], %s683_s21 }
  0x3b   : > { %v423_v6 = vmul.f32 %v400_v5, %v400_v5  ;;  %s495_s14 = sshll.u32 %s380_s11, 4  ;;  %s497_s18 = sshll.u32 %s493_s10, 4  ;;  %s496_s14 = int_to_ptr.vmem [resolvable:$true] %s495_s14  ;;  %s498_s18 = int_to_ptr.hbm [resolvable:$true] %s497_s18 }
  0x3c   : > { %v401_v4 = vmul.f32 %v399_v2, %v399_v2  ;;  %s480_s1 = scalar_lea.sflag [#allocation4], %s1125_s17  ;;  %s909_s12 = sshra.s32 %s498_s18, 4  ;;  %s910_s12 = int_to_ptr.hbm [resolvable:$true] %s909_s12 }
  0x3d   : > { %s911_s9 = scalar_lea.hbm %s910_s12, 16  ;;  %s915_s0 = scalar_lea.hbm %s1194_s4, 32 }
  0x3e   : > { %403 = vst [vmem:[#allocation1] ss:$2 sm:$0xff] %v401_v4  ;;  %p912_p4 = scmp.ne.s32.totalorder %s910_s12, %s911_s9  ;;  %p916_p7 = scmp.lt.s32.totalorder %s910_s12, %s1194_s4 }
  0x3f   : > { %p917_p8 = scmp.lt.s32.totalorder %s915_s0, %s911_s9 }
  0x40   : > { %p913_p5 = pnand %p912_p4, %p1067_p9 }
  0x41   : > { %p918_p10 = por %p917_p8, %p916_p7 }
  0x42   : > { %p914_p6 = pneg %p913_p5 }
  0x44   : > { %p919_p13 = pnand %p918_p10, %p914_p6 }
  0x45   : > { %v404_v7 = vld.sshfl [vmem:[#allocation1] sm:$0xff pattern:$0x75316420]  ;;  %v405_v8 = vld.sshfl [vmem:[#allocation1 + $0x8] sm:$0xff pattern:$0x75316420] }
  0x46   : > { %v409_v9 = vsel %vm408_vm0, %v404_v7, 0.0  ;;  %v416_v10 = vsel %vm408_vm0, %v405_v8, 0.0  ;;  %425 = vst [vmem:[#allocation1] ss:$2 sm:$0xff] %v423_v6 }
  0x47   : > { %v410_v11 = vrot.slane %v409_v9, 4  ;;  %v417_v12 = vrot.slane %v416_v10, 4 }
  0x49   : > { %v411_v13 = vadd.f32 %v410_v11, %v409_v9  ;;  %v418_v14 = vadd.f32 %v417_v12, %v416_v10 }
  0x4b   : > { %v412_v15 = vrot.slane %v411_v13, 2  ;;  %v419_v16 = vrot.slane %v418_v14, 2 }
  0x4d   : > { %v413_v17 = vadd.f32 %v412_v15, %v411_v13  ;;  %v420_v18 = vadd.f32 %v419_v16, %v418_v14  ;;  %v426_v19 = vld.sshfl [vmem:[#allocation1] sm:$0xff pattern:$0x75316420]  ;;  %v427_v20 = vld.sshfl [vmem:[#allocation1 + $0x8] sm:$0xff pattern:$0x75316420] }
  0x4e   : > { %v430_v21 = vsel %vm408_vm0, %v426_v19, 0.0  ;;  %v437_v22 = vsel %vm408_vm0, %v427_v20, 0.0 }
  0x4f   : > { %v414_v23 = vrot.slane %v413_v17, 1  ;;  %v421_v24 = vrot.slane %v420_v18, 1  ;;  %v431_v27 = vrot.slane %v430_v21, 4  ;;  %v438_v28 = vrot.slane %v437_v22, 4 }
  0x51   : > { %v415_v25 = vadd.f32 %v414_v23, %v413_v17  ;;  %v422_v26 = vadd.f32 %v421_v24, %v420_v18  ;;  %v432_v31 = vadd.f32 %v431_v27, %v430_v21  ;;  %v439_v32 = vadd.f32 %v438_v28, %v437_v22 }
  0x53   : > { %v444_v29 = vsub.f32 0.0, %v415_v25  ;;  %v445_v30 = vsub.f32 0.0, %v422_v26  ;;  %v433_v37 = vrot.slane %v432_v31, 2  ;;  %v440_v38 = vrot.slane %v439_v32, 2 }
  0x55   : > { %v446_v33 = vmul.f32 0.25, %v444_v29  ;;  %v447_v34 = vmul.f32 0.25, %v445_v30  ;;  %v434_v39 = vadd.f32 %v433_v37, %v432_v31  ;;  %v441_v40 = vadd.f32 %v440_v38, %v439_v32 }
  0x57   : > { %v450_v35 = vmul.f32 1.442695, %v447_v34  ;;  %v448_v36 = vmul.f32 1.442695, %v446_v33  ;;  %v435_v44 = vrot.slane %v434_v39, 1  ;;  %v442_v45 = vrot.slane %v441_v40, 1 }
  0x59   : > { %771 = vpow2.f32 %v450_v35  ;;  %v436_v49 = vadd.f32 %v435_v44, %v434_v39  ;;  %v443_v50 = vadd.f32 %v442_v45, %v441_v40 }
  0x5a   : > { %773 = vpow2.f32 %v448_v36 }
  0x5b   : > { %v465_v54 = vsel %vm455_vm1, %v415_v25, %v436_v49  ;;  %v466_v55 = vsel %vm455_vm1, %v422_v26, %v443_v50 }
  0x5f   : > { %v772_v41 = vpop.eup %771 }
  0x60   : > { %v454_v42 = vrot.slane %v772_v41, 7  ;;  %v774_v46 = vpop.eup %773 }
  0x62   : > { %v456_v47 = vsel %vm455_vm1, %v774_v46, %v454_v42 }
  0x63   : > { %v458_v48 = vsub.f32 %v398_v43, %v456_v47 }
  0x65   : > { %v459_v51 = vmul.f32 %v458_v48, %v458_v48 }
  0x67   : > { %v461_v52 = vperm.slane %v459_v51, 0  ;;  %v462_v53 = vperm.slane %v459_v51, 1 }
  0x69   : > { %v468_v56 = vsel %vm467_vm2, %v465_v54, %v461_v52  ;;  %v469_v57 = vsel %vm467_vm2, %v466_v55, %v462_v53 }
  0x6a   : > { %v471_v58 = vsel %vm470_vm3, %v468_v56, 0.0  ;;  %v472_v59 = vsel %vm470_vm3, %v469_v57, 0.0 }
  0x6b   : > { %477 = vst [vmem:[%s380_s11] sm:$0xff] %v471_v58 }
  0x6c   : > { %478 = vst [vmem:[%s380_s11 + $0x8] sm:$0xff] %v472_v59 }
  0x6d   : > { %922 = shalt.err (!%p919_p13)
}
  0x6e   : > { %701 = dma.vmem_to_hbm [thread:$0]  (%p1067_p9), %s496_s14, 256, %s498_s18, %s480_s1  }
  0x6f PF: > { %s1213_s17 = sld [smem:[#allocation16_spill]]  ;;  %s509_s5 = sand.u32 1, %s965_s15  }
  0x70   : > { %p717_p0 = pnand %p666_p12, %p1074_p11  ;;  %s510_s6 = scalar_lea.sflag [#allocation4], %s509_s5 }
  0x72   : > { %p718_p1 = pneg %p717_p0 }
  0x74   : > { %960 = dma.done.wait (%p718_p1), %s510_s6, 256  }
  0x75   : > { %962 = vsyncadd (%p718_p1), %s510_s6, 4294967040  ;;  %s26_s20 = sadd.s32 1, %s1213_s17   ;;  %s1214_s8 = sld [smem:[#allocation15_spill]] }
  0x76   : > { %p23_p2 = scmp.ge.s32.totalorder %s26_s20, 4   ;;  %s1215_s17 = sld [smem:[#allocation18_spill]] }
  0x77   : > { %s1216_s28 = sld [smem:[#allocation17_spill]]  ;;  %s1217_s15 = smov %s969_s16 }
  0x78   : > { %s1219_s18 = smov %s981_s19 }
  0x79   :  { %25 = sbr.rel (!%p23_p2) target bundleno = 13 (0xd), region = 122 }
  0x7b   : > { %s1218_s16 = smov %s1214_s8 }
  0x7d   : > { %s1220_s19 = smov %s1216_s28 }
  0x7e   :  { %516 = vsyncpa [#allocation3], 1 }
  0x7f   :  { %518 = vsyncpa [#allocation3 + $0x1], 1 }
  0x80   :  { %519 = vsyncpa [#allocation6], 1 }
  0x81   :  { %521 = vsyncpa [#allocation6 + $0x1], 1 }
  0x82   :  { %522 = vsyncpa [#allocation9], 1 }
  0x83   :  { %524 = vsyncpa [#allocation9 + $0x1], 1 }
  0x84   :  { %525 = vsyncpa [#allocation4], 1 }
  0x85   :  { %527 = vsyncpa [#allocation4 + $0x1], 1 }

</bundles_post_ra>
